<compile_context>
chip_gen: v6e
topology: v6e:2x2x1
jax: 0.10.0
libtpu: 0.0.40
codegen_flags: <defaults>
</compile_context>

<pallas_src>
import functools

import jax
import jax.numpy as jnp
from jax.experimental import pallas as pl
from jax.experimental.pallas import tpu as pltpu

MARGIN = 195.0


def _contrastive_loss_kernel(
    x0_ref, x1_ref, y_ref, out_ref, acc_ref, *, margin, batch, tile_b, need_mask
):
    # x0_ref, x1_ref: (TB, D) ; y_ref: (TB, 1) ; out_ref: (1, 1) f32
    # acc_ref: (1, 1) f32 VMEM scratch (persists across grid steps)
    i = pl.program_id(0)

    @pl.when(i == 0)
    def _():
        acc_ref[...] = jnp.zeros_like(acc_ref)

    # Cast in-kernel: inputs are streamed from HBM in their native dtype.
    x0 = x0_ref[...].astype(jnp.float32)
    x1 = x1_ref[...].astype(jnp.float32)
    diff = x0 - x1                                          # (TB, D)
    dist_sq = jnp.sum(diff * diff, axis=1, keepdims=True)   # (TB, 1)
    dist = jnp.sqrt(dist_sq)                                # (TB, 1)
    mdist = jnp.maximum(margin - dist, 0.0)                 # clamp(min=0)
    y = y_ref[...].astype(jnp.float32)                      # (TB, 1)
    loss = y * dist_sq + (1.0 - y) * (mdist * mdist)        # (TB, 1)

    if need_mask:
        # Zero out padded rows of the (possibly partial) last tile.
        row = i * tile_b + jax.lax.broadcasted_iota(jnp.int32, loss.shape, 0)
        loss = jnp.where(row < batch, loss, 0.0)

    acc_ref[...] = acc_ref[...] + jnp.sum(loss, keepdims=True)

    @pl.when(i == pl.num_programs(0) - 1)
    def _():
        out_ref[...] = acc_ref[...] * (0.5 / float(batch))


def _pick_tile_b(B, D, itemsize):
    """Largest batch tile (multiple of 8) fitting a conservative VMEM budget."""
    # 2 inputs * 2 pipeline buffers * TB * D * itemsize  <=  budget
    # 8 MiB keeps us well inside the scoped-VMEM defaults (16 MiB v5e,
    # 32 MiB v6e/v7x) while still giving large, near-roofline tiles.
    budget = 8 * 1024 * 1024
    per_row = 4 * D * itemsize
    tb = budget // max(per_row, 1)
    tb = int(max(8, (tb // 8) * 8))
    tb = min(tb, 4096)
    if tb >= B:
        return B  # single full-extent block
    return tb


def contrastive_loss(x0, x1, y, margin=MARGIN, tile_b=None):
    """JAX/Pallas equivalent of ContrastiveLoss(margin).forward(x0, x1, y)."""
    assert x0.shape == x1.shape and x0.ndim == 2
    B, D = x0.shape
    y2 = y.reshape(B, 1)  # keep native dtype; cast in-kernel

    itemsize = max(jnp.dtype(x0.dtype).itemsize, jnp.dtype(x1.dtype).itemsize)
    tb = tile_b if tile_b is not None else _pick_tile_b(B, D, itemsize)
    tb = min(tb, B)
    num_tiles = pl.cdiv(B, tb)
    need_mask = (B % tb) != 0

    kernel = functools.partial(
        _contrastive_loss_kernel,
        margin=float(margin),
        batch=B,
        tile_b=tb,
        need_mask=need_mask,
    )

    out = pl.pallas_call(
        kernel,
        out_shape=jax.ShapeDtypeStruct((1, 1), jnp.float32),
        grid=(num_tiles,),
        in_specs=[
            pl.BlockSpec((tb, D), lambda i: (i, 0)),
            pl.BlockSpec((tb, D), lambda i: (i, 0)),
            pl.BlockSpec((tb, 1), lambda i: (i, 0)),
        ],
        out_specs=pl.BlockSpec((1, 1), lambda i: (0, 0)),
        scratch_shapes=[pltpu.VMEM((1, 1), jnp.float32)],
        compiler_params=pltpu.CompilerParams(
            dimension_semantics=("arbitrary",),
        ),
    )(x0, x1, y2)
    return out[0, 0]


def _reference_loss(x0, x1, y, margin=MARGIN):
    x0 = x0.astype(jnp.float32)
    x1 = x1.astype(jnp.float32)
    y = y.reshape(-1).astype(jnp.float32)
    diff = x0 - x1
    dist_sq = jnp.sum(diff ** 2, axis=1)
    dist = jnp.sqrt(dist_sq)
    mdist = jnp.clip(margin - dist, 0.0)
    loss = y * dist_sq + (1.0 - y) * mdist ** 2
    return jnp.sum(loss) / 2.0 / x0.shape[0]


if __name__ == "__main__":
    key = jax.random.PRNGKey(0)
    k0, k1, k2, k3, k4, k5 = jax.random.split(key, 6)

    # Case 1: small shapes, single full-extent block (default tile choice).
    B, D = 8, 32
    x0 = jax.random.normal(k0, (B, D), dtype=jnp.float32) * 10.0
    x1 = jax.random.normal(k1, (B, D), dtype=jnp.float32) * 10.0
    y = jax.random.bernoulli(k2, 0.5, (B,)).astype(jnp.float32)

    loss = contrastive_loss(x0, x1, y)
    jax.block_until_ready(loss)
    ref = _reference_loss(x0, x1, y)
    assert jnp.allclose(loss, ref, rtol=1e-5, atol=1e-5), (loss, ref)

    # Case 2: force the multi-tile grid path (with a partial, masked last
    # tile) to exercise the accumulator / pipelining code path.
    B2, D2 = 20, 128
    a0 = jax.random.normal(k3, (B2, D2), dtype=jnp.float32) * 5.0
    a1 = jax.random.normal(k4, (B2, D2), dtype=jnp.float32) * 5.0
    yb = jax.random.bernoulli(k5, 0.5, (B2,)).astype(jnp.float32)

    loss2 = contrastive_loss(a0, a1, yb, tile_b=8)
    jax.block_until_ready(loss2)
    ref2 = _reference_loss(a0, a1, yb)
    assert jnp.allclose(loss2, ref2, rtol=1e-5, atol=1e-5), (loss2, ref2)

    print("KERNEL_OK")
</pallas_src>

<mosaic_0001>
module attributes {stable_mosaic.version = 11 : i64} {
  func.func @_contrastive_loss_kernel(%arg0: i32, %arg1: memref<8x32xf32, #tpu.memory_space<vmem>>, %arg2: memref<8x32xf32, #tpu.memory_space<vmem>>, %arg3: memref<8x1xf32, #tpu.memory_space<vmem>>, %arg4: memref<1x1xf32, #tpu.memory_space<vmem>>, %arg5: memref<1x1xf32, #tpu.memory_space<vmem>>) attributes {dimension_semantics = [#tpu.dimension_semantics<arbitrary>], iteration_bounds = array<i64: 1>, scalar_prefetch = 0 : i64, scratch_operands = 1 : i64, tpu.core_type = #tpu.core_type<tc>, window_params = [{transform_indices = @transform_0, window_bounds = array<i64: 8, 32>}, {transform_indices = @transform_1, window_bounds = array<i64: 8, 32>}, {transform_indices = @transform_2, window_bounds = array<i64: 8, 1>}, {pipeline_mode = #tpu.pipeline_mode<synchronous>, transform_indices = @transform_3, window_bounds = array<i64: 1, 1>}]} {
    %c0_i32 = arith.constant 0 : i32
    %0 = arith.cmpi eq, %arg0, %c0_i32 : i32
    %1 = arith.extui %0 : i1 to i32
    %c0_i32_0 = arith.constant 0 : i32
    %2 = arith.cmpi ne, %1, %c0_i32_0 : i32
    scf.if %2 {
      %cst_16 = arith.constant 0.000000e+00 : f32
      %32 = vector.broadcast %cst_16 : f32 to vector<1x1xf32>
      %c0_17 = arith.constant 0 : index
      %c0_18 = arith.constant 0 : index
      %33 = vector.load %arg5[%c0_17, %c0_18] : memref<1x1xf32, #tpu.memory_space<vmem>>, vector<1x1xf32>
      tpu.vector_store %arg5[%c0_17, %c0_18], %32 {strides = array<i32>} : memref<1x1xf32, #tpu.memory_space<vmem>>, vector<1x1xf32>,
    } else {
    }
    %c0 = arith.constant 0 : index
    %c0_1 = arith.constant 0 : index
    %3 = vector.load %arg1[%c0, %c0_1] : memref<8x32xf32, #tpu.memory_space<vmem>>, vector<8x32xf32>
    %c0_2 = arith.constant 0 : index
    %c0_3 = arith.constant 0 : index
    %4 = vector.load %arg2[%c0_2, %c0_3] : memref<8x32xf32, #tpu.memory_space<vmem>>, vector<8x32xf32>
    %5 = arith.subf %3, %4 : vector<8x32xf32>
    %6 = arith.mulf %5, %5 : vector<8x32xf32>
    %cst = arith.constant dense<0.000000e+00> : vector<8xf32>
    %7 = vector.multi_reduction <add>, %6, %cst [1] : vector<8x32xf32> to vector<8xf32>
    %8 = vector.shape_cast %7 : vector<8xf32> to vector<8x1xf32>
    %9 = math.sqrt %8 : vector<8x1xf32>
    %cst_4 = arith.constant 1.950000e+02 : f32
    %10 = vector.broadcast %cst_4 : f32 to vector<8x1xf32>
    %11 = arith.subf %10, %9 : vector<8x1xf32>
    %cst_5 = arith.constant 0.000000e+00 : f32
    %12 = vector.broadcast %cst_5 : f32 to vector<8x1xf32>
    %13 = arith.maximumf %11, %12 : vector<8x1xf32>
    %c0_6 = arith.constant 0 : index
    %c0_7 = arith.constant 0 : index
    %14 = vector.load %arg3[%c0_6, %c0_7] : memref<8x1xf32, #tpu.memory_space<vmem>>, vector<8x1xf32>
    %15 = arith.mulf %14, %8 : vector<8x1xf32>
    %cst_8 = arith.constant 1.000000e+00 : f32
    %16 = vector.broadcast %cst_8 : f32 to vector<8x1xf32>
    %17 = arith.subf %16, %14 : vector<8x1xf32>
    %18 = arith.mulf %13, %13 : vector<8x1xf32>
    %19 = arith.mulf %17, %18 : vector<8x1xf32>
    %20 = arith.addf %15, %19 : vector<8x1xf32>
    %c0_9 = arith.constant 0 : index
    %c0_10 = arith.constant 0 : index
    %21 = vector.load %arg5[%c0_9, %c0_10] : memref<1x1xf32, #tpu.memory_space<vmem>>, vector<1x1xf32>
    %22 = vector.shape_cast %20 : vector<8x1xf32> to vector<1x8x1xf32>
    %cst_11 = arith.constant dense<0.000000e+00> : vector<1xf32>
    %23 = vector.multi_reduction <add>, %22, %cst_11 [1, 2] : vector<1x8x1xf32> to vector<1xf32>
    %24 = vector.shape_cast %23 : vector<1xf32> to vector<1x1x1xf32>
    %25 = vector.extract %24[0, 0, 0] : f32 from vector<1x1x1xf32>
    %26 = vector.broadcast %25 : f32 to vector<1x1xf32>
    %27 = arith.addf %21, %26 : vector<1x1xf32>
    %c0_12 = arith.constant 0 : index
    %c0_13 = arith.constant 0 : index
    %28 = vector.load %arg5[%c0_12, %c0_13] : memref<1x1xf32, #tpu.memory_space<vmem>>, vector<1x1xf32>
    tpu.vector_store %arg5[%c0_12, %c0_13], %27 {strides = array<i32>} : memref<1x1xf32, #tpu.memory_space<vmem>>, vector<1x1xf32>,
    %c0_i32_14 = arith.constant 0 : i32
    %29 = arith.cmpi eq, %arg0, %c0_i32_14 : i32
    %30 = arith.extui %29 : i1 to i32
    %c0_i32_15 = arith.constant 0 : i32
    %31 = arith.cmpi ne, %30, %c0_i32_15 : i32
    scf.if %31 {
      %c0_16 = arith.constant 0 : index
      %c0_17 = arith.constant 0 : index
      %32 = vector.load %arg5[%c0_16, %c0_17] : memref<1x1xf32, #tpu.memory_space<vmem>>, vector<1x1xf32>
      %cst_18 = arith.constant 6.250000e-02 : f32
      %33 = vector.broadcast %cst_18 : f32 to vector<1x1xf32>
      %34 = arith.mulf %32, %33 : vector<1x1xf32>
      %c0_19 = arith.constant 0 : index
      %c0_20 = arith.constant 0 : index
      %35 = vector.load %arg4[%c0_19, %c0_20] : memref<1x1xf32, #tpu.memory_space<vmem>>, vector<1x1xf32>
      tpu.vector_store %arg4[%c0_19, %c0_20], %34 {strides = array<i32>} : memref<1x1xf32, #tpu.memory_space<vmem>>, vector<1x1xf32>,
    } else {
    }
    return
  }
  func.func @transform_0(%arg0: i32) -> (i32, i32) {
    %c0_i32 = arith.constant 0 : i32
    %c0_i32_0 = arith.constant 0 : i32
    return %arg0, %c0_i32 : i32, i32
  }
  func.func @transform_1(%arg0: i32) -> (i32, i32) {
    %c0_i32 = arith.constant 0 : i32
    %c0_i32_0 = arith.constant 0 : i32
    return %arg0, %c0_i32 : i32, i32
  }
  func.func @transform_2(%arg0: i32) -> (i32, i32) {
    %c0_i32 = arith.constant 0 : i32
    %c0_i32_0 = arith.constant 0 : i32
    return %arg0, %c0_i32 : i32, i32
  }
  func.func @transform_3(%arg0: i32) -> (i32, i32) {
    %c0_i32 = arith.constant 0 : i32
    %c0_i32_0 = arith.constant 0 : i32
    %c0_i32_1 = arith.constant 0 : i32
    return %c0_i32, %c0_i32_0 : i32, i32
  }
}

</mosaic_0001>

<bundles_post_ra>
// kernel: tpu_custom_call.1
= control target key start
LH: loop header
LB: loop body
LE: loop exit
PB: predicated region body
PF: predicated region fallthrough
CT: control target
= control target key end

     0   :  { %8 = vsyncpa [#allocation4], 0  ;;  %s182_s0 = inlined_call_operand.vmem [shape: f32[8,32], index: 0, kind: input, shape index: {}]   ;;  %s183_s1 = inlined_call_operand.hbm [shape: f32[8,32], index: 1, kind: input, shape index: {}]   ;;  %s184_s2 = inlined_call_operand.vmem [shape: f32[8,1], index: 2, kind: input, shape index: {}]   ;;  %s185_s3 = inlined_call_operand.hbm [shape: f32[1,1], index: 3, kind: output, shape index: {}]  }
   0x1   :  { %9 = vsyncpa [#allocation5], 0  ;;  %s144_s12 = smov [#allocation3]  }
   0x2   :  { %s18_s13 = sshll.u32 %s144_s12, 4  ;;  %s19_s13 = int_to_ptr.vmem [resolvable:$true] %s18_s13 }
   0x3   :  { %s108_s14 = scalar_lea.vmem %s19_s13, 128  ;;  %p113_p1 = scmp.lt.s32.totalorder %s19_s13, %s19_s13 }
   0x4   :  { %p109_p0 = scmp.ne.s32.totalorder %s19_s13, %s108_s14  ;;  %p114_p2 = scmp.lt.s32.totalorder %s108_s14, %s108_s14 }
   0x6   :  { %p115_p3 = por %p114_p2, %p113_p1 }
   0x8   :  { %p116_p4 = pnand %p115_p3, %p109_p0 }
   0xa   :  { %119 = shalt.err (!%p116_p4)
}
   0xb   :  { %21 = dma.hbm_to_vmem [thread:$0]  %s183_s1, 128, %s19_s13, [#allocation4]  }
   0xc   :  { %140 = dma.done.wait [#allocation4], 128  }
   0xd   :  { %141 = vsyncadd [#allocation4], 4294967168  ;;  %v33_v0 = vld [vmem:[%s182_s0] sm:$0xff]  ;;  %vm37_vm0 = vcmask 261120   ;;  %vm57_vm3 = vcmask 7168   ;;  %vm31_vm4 = vcmask 0  }
   0xe   :  { %v34_v1 = vld [vmem:[#allocation3] sm:$0xff]  ;;  %v145_v20 = vmov 0.0  }
   0xf   :  { %v35_v2 = vsub.f32 %v33_v0, %v34_v1  ;;  %v50_v12 = vld [vmem:[%s184_s2] sm:$0xff]  ;;  %32 = vst.msk [vmem:[#allocation2] sm:$0x1] %vm31_vm4, %v145_v20  ;;  %s146_s2 = smov [#allocation6]  }
  0x10   :  { %v52_v14 = vsub.f32 1.0, %v50_v12  ;;  %s84_s20 = sshll.u32 %s146_s2, 4  ;;  %s85_s20 = int_to_ptr.vmem [resolvable:$true] %s84_s20 }
  0x11   :  { %v36_v3 = vmul.f32 %v35_v2, %v35_v2  ;;  %s120_s21 = scalar_lea.vmem %s85_s20, 16  ;;  %s124_s22 = scalar_lea.vmem %s85_s20, 32 }
  0x12   :  { %p121_p5 = scmp.ne.s32.totalorder %s85_s20, %s120_s21  ;;  %p125_p6 = scmp.lt.s32.totalorder %s85_s20, %s85_s20 }
  0x13   :  { %v38_v4 = vsel %vm37_vm0, %v36_v3, 0.0  ;;  %p126_p7 = scmp.lt.s32.totalorder %s124_s22, %s120_s21 }
  0x14   :  { %39 = vadd.xlane.f32.xlu0 %v38_v4 }
  0x15   :  { %p127_p8 = por %p126_p7, %p125_p6 }
  0x16   :  { %v56_v28 = vld [vmem:[#allocation2] sm:$0x1] }
  0x17   :  { %p128_p9 = pnand %p127_p8, %p121_p5 }
  0x9d   :  { %v40_v5 = vpop.xlane.xlu0 %39 }
  0x9e   :  { %98 = vrsqrt.f32 %v40_v5  ;;  %vm43_vm1 = vcmp.eq.f32.partialorder %v40_v5, inf  ;;  %v46_v8 = vand.u32 2147483648, %v40_v5  ;;  %vm45_vm2 = vcmp.eq.f32.partialorder %v40_v5, 0.0 }
  0x9f   :  { %v51_v16 = vmul.f32 %v50_v12, %v40_v5 }
  0xab   :  { %v99_v6 = vpop.eup %98 }
  0xac   :  { %v42_v7 = vmul.f32 %v99_v6, %v40_v5 }
  0xae   :  { %v44_v9 = vsel %vm43_vm1, %v40_v5, %v42_v7 }
  0xaf   :  { %v47_v10 = vsel %vm45_vm2, %v46_v8, %v44_v9 }
  0xb0   :  { %v48_v11 = vsub.f32 195.0, %v47_v10 }
  0xb2   :  { %v49_v13 = vmax.f32 %v48_v11, 0.0 }
  0xb4   :  { %v53_v15 = vmul.f32 %v49_v13, %v49_v13 }
  0xb6   :  { %v54_v17 = vmul.f32 %v53_v15, %v52_v14 }
  0xb8   :  { %v55_v18 = vadd.f32 %v54_v17, %v51_v16 }
  0xba   :  { %v58_v19 = vsel %vm57_vm3, %v55_v18, 0.0 }
  0xbb   :  { %59 = vadd.xlane.f32.xlu0 %v58_v19 }
 0x144   :  { %v60_v21 = vpop.xlane.xlu0 %59 }
 0x145   :  { %v61_v22 = vrot.slane %v60_v21, 4 }
 0x147   :  { %v62_v23 = vadd.f32 %v61_v22, %v60_v21 }
 0x149   :  { %v63_v24 = vrot.slane %v62_v23, 2 }
 0x14b   :  { %v64_v25 = vadd.f32 %v63_v24, %v62_v23 }
 0x14d   :  { %v65_v26 = vrot.slane %v64_v25, 1 }
 0x14f   :  { %v66_v27 = vadd.f32 %v65_v26, %v64_v25 }
 0x151   :  { %93 = vpush %v66_v27 }
 0x182   :  { %s94_s0 = spop %93 }
 0x183   :  { %v68_v29 = vstv %s94_s0 }
 0x184   :  { %v69_v30 = vadd.f32 %v68_v29, %v56_v28 }
 0x186   :  { %71 = vst.msk [vmem:[#allocation2] sm:$0x1] %vm31_vm4, %v69_v30 }
 0x18d   :  { %v75_v31 = vld [vmem:[#allocation2] sm:$0x1] }
 0x18e   :  { %v76_v32 = vmul.f32 0.0625, %v75_v31 }
 0x190   :  { %77 = vst.msk [vmem:[#allocation6] sm:$0x1] %vm31_vm4, %v76_v32 }
 0x191   :  { %131 = shalt.err (!%p128_p9)
}
 0x192   :  { %87 = dma.vmem_to_hbm [thread:$0]  %s85_s20, 16, %s185_s3, [#allocation5]  }
 0x193   :  { %142 = dma.done.wait [#allocation5], 16  }
 0x194   :  { %143 = vsyncadd [#allocation5], 4294967280 }
 0x195   :  { %91 = vsyncpa [#allocation4], 1 }
 0x196   :  { %92 = vsyncpa [#allocation5], 1 }

</bundles_post_ra>
